<compile_context>
chip_gen: v7x
topology: tpu7x:2x2x1
jax: 0.10.0
libtpu: 0.0.40
codegen_flags: <defaults>
</compile_context>

<pallas_src>
import functools
import math

import jax
import jax.numpy as jnp
from jax import lax
from jax.experimental import pallas as pl
from jax.experimental.pallas import tpu as pltpu


def _round_up(a, b):
    return (a + b - 1) // b * b


def _deconv_kernel(xc_ref, w_ref, b_ref, o_ref, g_ref, col_ref, *,
                   K, pad, Wp, TH, Cin, Cin_pad, M, n_xblk, use_relu, cdt):
    """One (batch, output-row tile) per grid step.

    xc_ref : (1, Cin, TH*Wp)        column-padded input rows of this tile (cdt)
    w_ref  : (Cout, K*K*Cin_pad)    flipped / channel-swapped weight (cdt)
    b_ref  : (Cout, 1)              bias, f32
    o_ref  : (1, Cout, TH*Wp)       lane-dense output tile (cols >= Wout are scrap)
    g_ref  : (Cin_pad, (TH+pad)*Wp + pad)  f32 scratch: flat padded rows
    col_ref: (K*K*Cin_pad, TH*Wp)   cdt scratch: im2col matrix
    """
    t = pl.program_id(1)
    own = pad * Wp            # flat offset of this tile's own rows inside g

    # First row tile of each image: zero the padded-row buffer once.  The
    # constant-zero regions (top halo, channel-pad rows, row tails, end slack)
    # are never written afterwards, so there is no per-step re-zeroing.
    @pl.when(t == 0)
    def _():
        g_ref[...] = jnp.zeros_like(g_ref)

    # Own rows: one bulk lane-dense store of the whole (Cin, TH*Wp) block.  The
    # wrapper already inserted the left/right zero columns -> no masks/selects.
    @pl.when(t < n_xblk)
    def _():
        g_ref[:Cin, own:own + M] = xc_ref[0].astype(jnp.float32)

    # Bottom-padding tile(s): own rows are all zeros.
    @pl.when(t >= n_xblk)
    def _():
        g_ref[:, own:own + M] = jnp.zeros((Cin_pad, M), jnp.float32)

    # im2col: K*K contiguous lane windows of g -> (K*K*Cin_pad, TH*Wp).  The
    # destination rows are sublane-aligned (Cin_pad) and full-lane (M % 128 == 0),
    # so every tap store is unmasked.
    for kh in range(K):
        for kw in range(K):
            q = (kh * K + kw) * Cin_pad
            s = kh * Wp + kw
            col_ref[q:q + Cin_pad, :] = g_ref[:, s:s + M].astype(cdt)

    # Single MXU contraction (depth K*K*Cin_pad) + f32 epilogue.
    acc = jnp.dot(w_ref[...], col_ref[...], preferred_element_type=jnp.float32)
    acc = acc + b_ref[...]
    if use_relu:
        acc = jnp.maximum(acc, 0.0)
    o_ref[0] = acc.astype(o_ref.dtype)

    # Carry the next tile's top halo (the last `pad` stored rows) inside VMEM
    # -> zero additional activation HBM traffic for the halo.
    if pad > 0:
        @pl.when(t < pl.num_programs(1) - 1)
        def _():
            g_ref[:, 0:pad * Wp] = g_ref[:, TH * Wp:(TH + pad) * Wp]


def basic_deconv(x, weight, bias, *, kernel_size=3, stride=1, padding=0,
                 dilation=1, groups=1, relu=False, bn=False,
                 compute_dtype=jnp.bfloat16, tile_h=None):
    """Forward of BasicdeConv (bn=False path).

    x      : (N, Cin, H, W)
    weight : (Cin, Cout, K, K)   -- PyTorch ConvTranspose2d layout
    bias   : (Cout,)
    returns: (N, Cout, H + K - 1, W + K - 1)
    """
    if bn:
        # TODO(synk): BatchNorm2d branch (bn=True) not implemented.
        raise NotImplementedError("bn=True branch is not implemented")
    assert stride == 1 and padding == 0 and dilation == 1 and groups == 1, (
        "kernel implements the module's default hyper-parameters")

    N, Cin, H, W = x.shape
    K = kernel_size
    Cout = weight.shape[1]
    pad = K - 1
    Hout, Wout = H + pad, W + pad

    cdt = jnp.dtype(compute_dtype) if compute_dtype is not None else jnp.dtype(x.dtype)
    sub = 16 if cdt.itemsize == 2 else 8       # sublane packing of the matmul dtype
    Cin_pad = _round_up(Cin, sub)
    KKCp = K * K * Cin_pad
    out_itemsize = jnp.dtype(x.dtype).itemsize

    def _row_width(th):
        # smallest padded row width >= W + 2*pad making th*Wp a multiple of 128
        step = 128 // math.gcd(th, 128)
        return _round_up(W + 2 * pad, step)

    def _vmem_need(th):
        wp = _row_width(th)
        m = th * wp
        return (2 * Cin * m * cdt.itemsize              # double-buffered input block
                + 2 * Cout * m * out_itemsize           # double-buffered output block
                + 2 * Cout * KKCp * cdt.itemsize        # weight block
                + Cin_pad * ((th + pad) * wp + pad) * 4  # g scratch (f32)
                + KKCp * m * cdt.itemsize)              # im2col scratch

    if tile_h is not None:
        assert H % tile_h == 0 and (tile_h % 8 == 0 or tile_h == H), (
            "tile_h must divide H and be a multiple of 8 (or equal H)")
        TH = tile_h
    else:
        # Largest row tile (whole image, or a multiple of 8 dividing H) whose
        # working set fits a v7x-safe VMEM budget.
        cands = [H]
        if H % 8 == 0:
            cands += [h for h in range(H - 8, 0, -8) if H % h == 0]
        TH = cands[-1]
        for th in cands:
            if _vmem_need(th) <= 32 * 1024 * 1024:
                TH = th
                break

    Wp = _row_width(TH)
    M = TH * Wp                         # lane-dense tile width, multiple of 128
    L = (TH + pad) * Wp + pad           # flat padded-row buffer length
    n_xblk = max(H // TH, 1)            # input row tiles holding real data
    HT = -(-Hout // TH)                 # output row tiles

    # Column padding once in HBM (tiny, fused): every row becomes
    # [pad zeros | W data | zeros] of width Wp, so the kernel never needs column
    # masks and its row copy is one contiguous store.
    xp = jnp.pad(x, ((0, 0), (0, 0), (0, 0), (pad, Wp - W - pad)))
    xp = xp.reshape(N, Cin, H * Wp).astype(cdt)

    # ConvTranspose2d == correlation with the spatially flipped kernel, channel
    # axes swapped; (kh, kw, ci) contraction order, ci zero-padded to Cin_pad.
    wf = jnp.flip(weight, axis=(2, 3))                   # (Cin, Cout, K, K)
    wt = jnp.transpose(wf, (1, 2, 3, 0))                 # (Cout, K, K, Cin)
    wt = jnp.pad(wt, ((0, 0), (0, 0), (0, 0), (0, Cin_pad - Cin)))
    w2d = wt.reshape(Cout, KKCp).astype(cdt)
    b2d = bias.reshape(Cout, 1).astype(jnp.float32)

    kernel = functools.partial(
        _deconv_kernel, K=K, pad=pad, Wp=Wp, TH=TH, Cin=Cin, Cin_pad=Cin_pad,
        M=M, n_xblk=n_xblk, use_relu=relu, cdt=cdt)

    out = pl.pallas_call(
        kernel,
        out_shape=jax.ShapeDtypeStruct((N, Cout, HT * M), x.dtype),
        grid_spec=pltpu.PrefetchScalarGridSpec(
            num_scalar_prefetch=0,
            grid=(N, HT),
            in_specs=[
                # this tile's own input rows (index clamped for the bottom-pad
                # tile, which ignores its content)
                pl.BlockSpec((1, Cin, M),
                             lambda n, t: (n, 0, jnp.minimum(t, n_xblk - 1))),
                pl.BlockSpec((Cout, KKCp), lambda n, t: (0, 0)),
                pl.BlockSpec((Cout, 1), lambda n, t: (0, 0)),
            ],
            # Output written directly in (N, Cout, row-tile) order: no wrapper
            # transpose; unmasked lane-dense stores (M % 128 == 0).
            out_specs=pl.BlockSpec((1, Cout, M), lambda n, t: (n, 0, t)),
            scratch_shapes=[
                pltpu.VMEM((Cin_pad, L), jnp.float32),   # flat padded-row buffer
                pltpu.VMEM((KKCp, M), cdt),              # im2col matrix
            ],
        ),
        compiler_params=pltpu.CompilerParams(
            # batch axis parallel (megacore / v7x 2 TCs); row-tile axis arbitrary
            # (sequential halo carry in VMEM scratch).
            dimension_semantics=("parallel", "arbitrary"),
            vmem_limit_bytes=48 * 1024 * 1024),
    )(xp, w2d, b2d)

    # (N, Cout, HT*TH*Wp) -> (N, Cout, Hout, Wout): free reshape + one crop.
    out = out.reshape(N, Cout, HT * TH, Wp)
    return out[:, :, :Hout, :Wout]


def _reference(x_nchw, weight, bias, *, relu=False):
    """Independent XLA reference: regular conv on the zero-padded input."""
    K = weight.shape[2]
    w_conv = jnp.transpose(jnp.flip(weight, axis=(2, 3)), (1, 0, 2, 3))  # OIHW
    y = lax.conv_general_dilated(
        x_nchw, w_conv,
        window_strides=(1, 1),
        padding=[(K - 1, K - 1), (K - 1, K - 1)],
        dimension_numbers=("NCHW", "OIHW", "NCHW"))
    y = y + bias[None, :, None, None]
    if relu:
        y = jnp.maximum(y, 0.0)
    return y


if __name__ == "__main__":
    key = jax.random.PRNGKey(0)
    kx, kw, kb = jax.random.split(key, 3)

    N, Cin, H, W = 2, 4, 16, 16
    Cout, K = 8, 3

    x = jax.random.normal(kx, (N, Cin, H, W), dtype=jnp.float32)
    # PyTorch ConvTranspose2d weight layout: (in_planes, out_planes, K, K).
    weight = 0.1 * jax.random.normal(kw, (Cin, Cout, K, K), dtype=jnp.float32)
    bias = 0.05 * jax.random.normal(kb, (Cout,), dtype=jnp.float32)

    y_ref = _reference(x, weight, bias)

    # f32 compute path (exact check), whole-image row tile.
    y32 = jax.block_until_ready(
        basic_deconv(x, weight, bias, kernel_size=K, compute_dtype=jnp.float32))
    assert y32.shape == (N, Cout, H + K - 1, W + K - 1), y32.shape
    assert jnp.allclose(y32, y_ref, atol=1e-4, rtol=1e-4), float(
        jnp.max(jnp.abs(y32 - y_ref)))

    # f32 compute path with explicit row tiling (exercises the VMEM halo carry).
    y32t = jax.block_until_ready(
        basic_deconv(x, weight, bias, kernel_size=K, compute_dtype=jnp.float32,
                     tile_h=8))
    assert jnp.allclose(y32t, y_ref, atol=1e-4, rtol=1e-4), float(
        jnp.max(jnp.abs(y32t - y_ref)))

    # Default bf16-operand path (f32 accumulation): loose tolerance is expected
    # precision loss, not a kernel bug.
    ybf = jax.block_until_ready(basic_deconv(x, weight, bias, kernel_size=K))
    assert jnp.allclose(ybf, y_ref, atol=5e-2, rtol=5e-2), float(
        jnp.max(jnp.abs(ybf - y_ref)))

    # ReLU epilogue path.
    yr = jax.block_until_ready(
        basic_deconv(x, weight, bias, kernel_size=K, relu=True,
                     compute_dtype=jnp.float32))
    assert jnp.allclose(yr, _reference(x, weight, bias, relu=True),
                        atol=1e-4, rtol=1e-4)

    print("KERNEL_OK")
</pallas_src>

<mosaic_0001>
module attributes {stable_mosaic.version = 11 : i64} {
  func.func @_deconv_kernel(%arg0: i32, %arg1: i32, %arg2: memref<1x4x384xf32, #tpu.memory_space<vmem>>, %arg3: memref<8x72xf32, #tpu.memory_space<vmem>>, %arg4: memref<8x1xf32, #tpu.memory_space<vmem>>, %arg5: memref<1x8x384xf32, #tpu.memory_space<vmem>>, %arg6: memref<8x434xf32, #tpu.memory_space<vmem>>, %arg7: memref<72x384xf32, #tpu.memory_space<vmem>>) attributes {dimension_semantics = [#tpu.dimension_semantics<parallel>, #tpu.dimension_semantics<arbitrary>], iteration_bounds = array<i64: 2, 2>, scalar_prefetch = 0 : i64, scratch_operands = 2 : i64, tpu.core_type = #tpu.core_type<tc>, window_params = [{transform_indices = @transform_0, window_bounds = array<i64: 1, 4, 384>}, {pipeline_mode = #tpu.pipeline_mode<synchronous>, transform_indices = @transform_1, window_bounds = array<i64: 8, 72>}, {pipeline_mode = #tpu.pipeline_mode<synchronous>, transform_indices = @transform_2, window_bounds = array<i64: 8, 1>}, {transform_indices = @transform_3, window_bounds = array<i64: 1, 8, 384>}]} {
    %c0_i32 = arith.constant 0 : i32
    %0 = arith.cmpi eq, %arg1, %c0_i32 : i32
    %1 = arith.extui %0 : i1 to i32
    %c0_i32_0 = arith.constant 0 : i32
    %2 = arith.cmpi ne, %1, %c0_i32_0 : i32
    scf.if %2 {
      %cst_36 = arith.constant 0.000000e+00 : f32
      %39 = vector.broadcast %cst_36 : f32 to vector<8x434xf32>
      %c0_37 = arith.constant 0 : index
      %c0_38 = arith.constant 0 : index
      %40 = vector.load %arg6[%c0_37, %c0_38] : memref<8x434xf32, #tpu.memory_space<vmem>>, vector<8x434xf32>
      tpu.vector_store %arg6[%c0_37, %c0_38], %39 {strides = array<i32>} : memref<8x434xf32, #tpu.memory_space<vmem>>, vector<8x434xf32>,
    } else {
    }
    %c1_i32 = arith.constant 1 : i32
    %3 = arith.cmpi slt, %arg1, %c1_i32 : i32
    %4 = arith.extui %3 : i1 to i32
    %c0_i32_1 = arith.constant 0 : i32
    %5 = arith.cmpi ne, %4, %c0_i32_1 : i32
    scf.if %5 {
      %c0_36 = arith.constant 0 : index
      %c0_37 = arith.constant 0 : index
      %c0_38 = arith.constant 0 : index
      %39 = vector.load %arg2[%c0_36, %c0_37, %c0_38] : memref<1x4x384xf32, #tpu.memory_space<vmem>>, vector<1x4x384xf32>
      %40 = vector.shape_cast %39 : vector<1x4x384xf32> to vector<4x384xf32>
      %c0_39 = arith.constant 0 : index
      %c48_40 = arith.constant 48 : index
      %41 = vector.load %arg6[%c0_39, %c48_40] : memref<8x434xf32, #tpu.memory_space<vmem>>, vector<4x384xf32>
      tpu.vector_store %arg6[%c0_39, %c48_40], %40 {strides = array<i32>} : memref<8x434xf32, #tpu.memory_space<vmem>>, vector<4x384xf32>,
    } else {
    }
    %c1_i32_2 = arith.constant 1 : i32
    %6 = arith.cmpi sge, %arg1, %c1_i32_2 : i32
    %7 = arith.extui %6 : i1 to i32
    %c0_i32_3 = arith.constant 0 : i32
    %8 = arith.cmpi ne, %7, %c0_i32_3 : i32
    scf.if %8 {
      %cst_36 = arith.constant 0.000000e+00 : f32
      %39 = vector.broadcast %cst_36 : f32 to vector<8x384xf32>
      %c0_37 = arith.constant 0 : index
      %c48_38 = arith.constant 48 : index
      %40 = vector.load %arg6[%c0_37, %c48_38] : memref<8x434xf32, #tpu.memory_space<vmem>>, vector<8x384xf32>
      tpu.vector_store %arg6[%c0_37, %c48_38], %39 {strides = array<i32>} : memref<8x434xf32, #tpu.memory_space<vmem>>, vector<8x384xf32>,
    } else {
    }
    %c0 = arith.constant 0 : index
    %c0_4 = arith.constant 0 : index
    %9 = vector.load %arg6[%c0, %c0_4] : memref<8x434xf32, #tpu.memory_space<vmem>>, vector<8x384xf32>
    %c0_5 = arith.constant 0 : index
    %c0_6 = arith.constant 0 : index
    %10 = vector.load %arg7[%c0_5, %c0_6] : memref<72x384xf32, #tpu.memory_space<vmem>>, vector<8x384xf32>
    tpu.vector_store %arg7[%c0_5, %c0_6], %9 {strides = array<i32>} : memref<72x384xf32, #tpu.memory_space<vmem>>, vector<8x384xf32>,
    %c0_7 = arith.constant 0 : index
    %c1 = arith.constant 1 : index
    %11 = vector.load %arg6[%c0_7, %c1] : memref<8x434xf32, #tpu.memory_space<vmem>>, vector<8x384xf32>
    %c8 = arith.constant 8 : index
    %c0_8 = arith.constant 0 : index
    %12 = vector.load %arg7[%c8, %c0_8] : memref<72x384xf32, #tpu.memory_space<vmem>>, vector<8x384xf32>
    tpu.vector_store %arg7[%c8, %c0_8], %11 {strides = array<i32>} : memref<72x384xf32, #tpu.memory_space<vmem>>, vector<8x384xf32>,
    %c0_9 = arith.constant 0 : index
    %c2 = arith.constant 2 : index
    %13 = vector.load %arg6[%c0_9, %c2] : memref<8x434xf32, #tpu.memory_space<vmem>>, vector<8x384xf32>
    %c16 = arith.constant 16 : index
    %c0_10 = arith.constant 0 : index
    %14 = vector.load %arg7[%c16, %c0_10] : memref<72x384xf32, #tpu.memory_space<vmem>>, vector<8x384xf32>
    tpu.vector_store %arg7[%c16, %c0_10], %13 {strides = array<i32>} : memref<72x384xf32, #tpu.memory_space<vmem>>, vector<8x384xf32>,
    %c0_11 = arith.constant 0 : index
    %c24 = arith.constant 24 : index
    %15 = vector.load %arg6[%c0_11, %c24] : memref<8x434xf32, #tpu.memory_space<vmem>>, vector<8x384xf32>
    %c24_12 = arith.constant 24 : index
    %c0_13 = arith.constant 0 : index
    %16 = vector.load %arg7[%c24_12, %c0_13] : memref<72x384xf32, #tpu.memory_space<vmem>>, vector<8x384xf32>
    tpu.vector_store %arg7[%c24_12, %c0_13], %15 {strides = array<i32>} : memref<72x384xf32, #tpu.memory_space<vmem>>, vector<8x384xf32>,
    %c0_14 = arith.constant 0 : index
    %c25 = arith.constant 25 : index
    %17 = vector.load %arg6[%c0_14, %c25] : memref<8x434xf32, #tpu.memory_space<vmem>>, vector<8x384xf32>
    %c32 = arith.constant 32 : index
    %c0_15 = arith.constant 0 : index
    %18 = vector.load %arg7[%c32, %c0_15] : memref<72x384xf32, #tpu.memory_space<vmem>>, vector<8x384xf32>
    tpu.vector_store %arg7[%c32, %c0_15], %17 {strides = array<i32>} : memref<72x384xf32, #tpu.memory_space<vmem>>, vector<8x384xf32>,
    %c0_16 = arith.constant 0 : index
    %c26 = arith.constant 26 : index
    %19 = vector.load %arg6[%c0_16, %c26] : memref<8x434xf32, #tpu.memory_space<vmem>>, vector<8x384xf32>
    %c40 = arith.constant 40 : index
    %c0_17 = arith.constant 0 : index
    %20 = vector.load %arg7[%c40, %c0_17] : memref<72x384xf32, #tpu.memory_space<vmem>>, vector<8x384xf32>
    tpu.vector_store %arg7[%c40, %c0_17], %19 {strides = array<i32>} : memref<72x384xf32, #tpu.memory_space<vmem>>, vector<8x384xf32>,
    %c0_18 = arith.constant 0 : index
    %c48 = arith.constant 48 : index
    %21 = vector.load %arg6[%c0_18, %c48] : memref<8x434xf32, #tpu.memory_space<vmem>>, vector<8x384xf32>
    %c48_19 = arith.constant 48 : index
    %c0_20 = arith.constant 0 : index
    %22 = vector.load %arg7[%c48_19, %c0_20] : memref<72x384xf32, #tpu.memory_space<vmem>>, vector<8x384xf32>
    tpu.vector_store %arg7[%c48_19, %c0_20], %21 {strides = array<i32>} : memref<72x384xf32, #tpu.memory_space<vmem>>, vector<8x384xf32>,
    %c0_21 = arith.constant 0 : index
    %c49 = arith.constant 49 : index
    %23 = vector.load %arg6[%c0_21, %c49] : memref<8x434xf32, #tpu.memory_space<vmem>>, vector<8x384xf32>
    %c56 = arith.constant 56 : index
    %c0_22 = arith.constant 0 : index
    %24 = vector.load %arg7[%c56, %c0_22] : memref<72x384xf32, #tpu.memory_space<vmem>>, vector<8x384xf32>
    tpu.vector_store %arg7[%c56, %c0_22], %23 {strides = array<i32>} : memref<72x384xf32, #tpu.memory_space<vmem>>, vector<8x384xf32>,
    %c0_23 = arith.constant 0 : index
    %c50 = arith.constant 50 : index
    %25 = vector.load %arg6[%c0_23, %c50] : memref<8x434xf32, #tpu.memory_space<vmem>>, vector<8x384xf32>
    %c64 = arith.constant 64 : index
    %c0_24 = arith.constant 0 : index
    %26 = vector.load %arg7[%c64, %c0_24] : memref<72x384xf32, #tpu.memory_space<vmem>>, vector<8x384xf32>
    tpu.vector_store %arg7[%c64, %c0_24], %25 {strides = array<i32>} : memref<72x384xf32, #tpu.memory_space<vmem>>, vector<8x384xf32>,
    %c0_25 = arith.constant 0 : index
    %c0_26 = arith.constant 0 : index
    %27 = vector.load %arg3[%c0_25, %c0_26] : memref<8x72xf32, #tpu.memory_space<vmem>>, vector<8x72xf32>
    %c0_27 = arith.constant 0 : index
    %c0_28 = arith.constant 0 : index
    %28 = vector.load %arg7[%c0_27, %c0_28] : memref<72x384xf32, #tpu.memory_space<vmem>>, vector<72x384xf32>
    %cst = arith.constant dense<0.000000e+00> : vector<8x384xf32>
    %29 = tpu.matmul %27, %28, %cst {dimension_numbers = #tpu.dot_dimension_numbers<[1], [0], [0], [1], [0, 0, 1, 1], [], []>} : vector<8x72xf32>, vector<72x384xf32>, vector<8x384xf32> -> vector<8x384xf32>
    %c0_29 = arith.constant 0 : index
    %c0_30 = arith.constant 0 : index
    %30 = vector.load %arg4[%c0_29, %c0_30] : memref<8x1xf32, #tpu.memory_space<vmem>>, vector<8x1xf32>
    %31 = vector.broadcast %30 : vector<8x1xf32> to vector<8x384xf32>
    %32 = arith.addf %29, %31 : vector<8x384xf32>
    %c0_31 = arith.constant 0 : index
    %c0_32 = arith.constant 0 : index
    %c0_33 = arith.constant 0 : index
    %33 = vector.load %arg5[%c0_31, %c0_32, %c0_33] : memref<1x8x384xf32, #tpu.memory_space<vmem>>, vector<1x8x384xf32>
    %34 = vector.shape_cast %33 : vector<1x8x384xf32> to vector<8x384xf32>
    %35 = vector.shape_cast %32 : vector<8x384xf32> to vector<1x8x384xf32>
    tpu.vector_store %arg5[%c0_31, %c0_32, %c0_33], %35 {strides = array<i32>} : memref<1x8x384xf32, #tpu.memory_space<vmem>>, vector<1x8x384xf32>,
    %c1_i32_34 = arith.constant 1 : i32
    %36 = arith.cmpi slt, %arg1, %c1_i32_34 : i32
    %37 = arith.extui %36 : i1 to i32
    %c0_i32_35 = arith.constant 0 : i32
    %38 = arith.cmpi ne, %37, %c0_i32_35 : i32
    scf.if %38 {
      %c0_36 = arith.constant 0 : index
      %c384 = arith.constant 384 : index
      %39 = vector.load %arg6[%c0_36, %c384] : memref<8x434xf32, #tpu.memory_space<vmem>>, vector<8x48xf32>
      %c0_37 = arith.constant 0 : index
      %c0_38 = arith.constant 0 : index
      %40 = vector.load %arg6[%c0_37, %c0_38] : memref<8x434xf32, #tpu.memory_space<vmem>>, vector<8x48xf32>
      tpu.vector_store %arg6[%c0_37, %c0_38], %39 {strides = array<i32>} : memref<8x434xf32, #tpu.memory_space<vmem>>, vector<8x48xf32>,
    } else {
    }
    return
  }
  func.func @transform_0(%arg0: i32, %arg1: i32) -> (i32, i32, i32) {
    %c0_i32 = arith.constant 0 : i32
    %0 = arith.minsi %arg1, %c0_i32 : i32
    %c0_i32_0 = arith.constant 0 : i32
    %c0_i32_1 = arith.constant 0 : i32
    return %arg0, %c0_i32_0, %0 : i32, i32, i32
  }
  func.func @transform_1(%arg0: i32, %arg1: i32) -> (i32, i32) {
    %c0_i32 = arith.constant 0 : i32
    %c0_i32_0 = arith.constant 0 : i32
    %c0_i32_1 = arith.constant 0 : i32
    return %c0_i32, %c0_i32_0 : i32, i32
  }
  func.func @transform_2(%arg0: i32, %arg1: i32) -> (i32, i32) {
    %c0_i32 = arith.constant 0 : i32
    %c0_i32_0 = arith.constant 0 : i32
    %c0_i32_1 = arith.constant 0 : i32
    return %c0_i32, %c0_i32_0 : i32, i32
  }
  func.func @transform_3(%arg0: i32, %arg1: i32) -> (i32, i32, i32) {
    %c0_i32 = arith.constant 0 : i32
    %c0_i32_0 = arith.constant 0 : i32
    return %arg0, %c0_i32, %arg1 : i32, i32, i32
  }
}

</mosaic_0001>

<bundles_post_ra>
// kernel: tpu_custom_call.1
= control target key start
LH: loop header
LB: loop body
LE: loop exit
PB: predicated region body
PF: predicated region fallthrough
CT: control target
= control target key end

     0   :  { %8 = vsyncpa [#allocation5], 0  ;;  %s1503_s0 = inlined_call_operand.hbm [shape: f32[2,4,384], index: 0, kind: input, shape index: {}]   ;;  %s1504_s1 = inlined_call_operand.vmem [shape: f32[8,72], index: 1, kind: input, shape index: {}]   ;;  %s1505_s2 = inlined_call_operand.vmem [shape: f32[8,1], index: 2, kind: input, shape index: {}]   ;;  %s1506_s3 = inlined_call_operand.hbm [shape: f32[2,8,768], index: 3, kind: output, shape index: {}]  }
   0x1   :  { %10 = vsyncpa [#allocation5 + $0x1], 0 }
   0x2   :  { %11 = vsyncpa [#allocation6], 0 }
   0x3   :  { %13 = vsyncpa [#allocation6 + $0x1], 0  ;;  %s1228_s12 = smov 0   ;;  %s1230_s13 = smov 0  }
   0x4   :  { %s1232_s14 = smov 0   ;;  %s1234_s15 = smov 0  }
   0x5   :  { %s1236_s16 = smov 0   ;;  %s1238_s17 = smov 0  }
   0x6   :  { %s1240_s18 = smov 0   ;;  %s1242_s19 = smov 0  }
   0x7   :  { %s1244_s20 = smov 0   ;;  %s1246_s21 = smov 0  }
   0x8   :  { %s1248_s22 = smov 0  }
   0x9 LB: > { %s768_s23 = sadd.s32 4294967295, %s1189_s22   ;;  %s769_s24 = sadd.s32 4294967294, %s1189_s22   ;;  %s1189_s22 = sphi %s1248_s22, %s19_s22   ;;  %s1185_s21 = sphi %s1246_s21, %s1529_s21   ;;  %s1181_s20 = sphi %s1244_s20, %s1528_s20   ;;  %s1177_s19 = sphi %s1242_s19, %s1527_s19   ;;  %s1173_s18 = sphi %s1240_s18, %s1526_s18   ;;  %s1169_s17 = sphi %s1238_s17, %s1525_s17   ;;  %s1165_s16 = sphi %s1236_s16, %s1524_s16   ;;  %s1161_s15 = sphi %s1234_s15, %s1523_s15   ;;  %s1157_s14 = sphi %s1232_s14, %s1522_s14   ;;  %s1153_s13 = sphi %s1230_s13, %s1521_s13   ;;  %s1149_s12 = sphi %s1228_s12, %s1520_s12  }
   0xa   : > { %s28_s25 = sadd.s32 1, %s1181_s20  ;;  %s31_s26 = sadd.s32 1, %s1185_s21 }
   0xb   : > { %p29_p0 = scmp.ge.s32.totalorder %s28_s25, 2  ;;  %s44_s27 = sadd.s32 1, %s1169_s17 }
   0xc   : > { %p51_p1 = scmp.ne.s32.totalorder %s1169_s17, %s1165_s16  ;;  %p52_p3 = scmp.eq.s32.totalorder %s1189_s22, 0 }
   0xd   : > { %s1531_s25 = smov (%p29_p0, %s28_s25), 0  ;;  %s1533_s26 = smov (!%p29_p0, %s31_s26), %s1185_s21 }
   0xe   : > { %p33_p2 = scmp.ge.s32.totalorder %s1533_s26, 2  ;;  %p57_p4 = scmp.ne.s32.totalorder %s1165_s16, %s1161_s15 }
   0xf   : > { %p1297_p5 = por %p52_p3, %p51_p1  ;;  %p58_p6 = scmp.eq.s32.totalorder %s768_s23, 0 }
  0x10   : > { %s1535_s26 = smov (%p33_p2, %s1533_s26), 0  ;;  %s110_s30 = ssub.s32 %s1181_s20, %s1531_s25 }
  0x11   : > { %1509 = sst [smem:[#allocation10_spill]] %s1535_s26  ;;  %s39_s28 = ssub.s32 %s1185_s21, %s1535_s26 }
  0x12   : > { %p42_p7 = scmp.eq.s32.totalorder %s39_s28, 0  ;;  %p1303_p8 = por %p58_p6, %p57_p4 }
  0x13   : > { %s111_s5 = sor.u32 %s110_s30, %s39_s28  ;;  %s114_s6 = sadd.s32 1, %s1157_s14 }
  0x14   : > { %s1309_s7 = scalar_select %p42_p7, %s1169_s17, %s44_s27  }
  0x15   : > { %p112_p9 = scmp.eq.s32.totalorder %s111_s5, 0  ;;  %p124_p10 = scmp.ne.s32.totalorder %s1157_s14, %s1153_s13 }
  0x16   : > { %p125_p11 = scmp.eq.s32.totalorder %s768_s23, 3  ;;  %p130_p12 = scmp.ne.s32.totalorder %s1153_s13, %s1149_s12 }
  0x17   : > { %s1316_s8 = scalar_select %p112_p9, %s1157_s14, %s114_s6  }
  0x18   : > { %p1318_p13 = por %p125_p11, %p124_p10  ;;  %p131_p0 = scmp.eq.s32.totalorder %s769_s24, 3 }
  0x19   : > { %p859_p1 = scmp.lt.s32.totalorder %s1189_s22, 4  ;;  %s157_s11 = sand.u32 1, %s1169_s17  }
  0x1a   : > { %s1512_s9 = scalar_select %p1318_p13, 1, 0 }
  0x1b   : > { %p1323_p2 = por %p131_p0, %p130_p12  ;;  %s842_s15 = smul.u32 12, %s157_s11 }
  0x1c   : > { %p1330_p3 = pnand %p859_p1, %p1297_p5  ;;  %s1146_s30 = smul.u32 192, %s1185_s21 }
  0x1d   : > { %s1513_s10 = scalar_select %p1323_p2, 1, 0 }
  0x1e   : > { %s161_s23 = scalar_lea.vmem [#allocation4], %s842_s15  ;;  %s1341_s6 = scalar_lea.hbm %s1503_s0, %s1146_s30 }
  0x1f   : > { %s173_s28 = sshll.u32 %s161_s23, 4  ;;  %s158_s29 = scalar_lea.sflag [#allocation5], %s157_s11  ;;  %s1334_s28 = int_to_ptr.vmem [resolvable:$true] %s173_s28 }
  0x20   : > { %s1036_s26 = scalar_lea.hbm %s1341_s6, 192  ;;  %p1038_p7 = pneg %p1330_p3 }
  0x21   : > { %p1037_p6 = scmp.ne.s32.totalorder %s1341_s6, %s1036_s26  ;;  %s1041_s24 = scalar_lea.hbm %s1503_s0, 384 }
  0x22   : > { %p1042_p11 = scmp.lt.u32.totalorder %s1341_s6, %s1503_s0  ;;  %p1043_p12 = scmp.lt.u32.totalorder %s1041_s24, %s1036_s26 }
  0x23   : > { %p1039_p9 = pnand %p1038_p7, %p1037_p6  ;;  %p1045_p1 = scmp.lt.u32.totalorder %s1036_s26, %s1341_s6 }
  0x24   : > { %p1044_p0 = por %p1043_p12, %p1042_p11 }
  0x25   : > { %p1040_p10 = pneg %p1039_p9 }
  0x26   : > { %p1046_p4 = por %p1045_p1, %p1044_p0 }
  0x28   : > { %p1047_p5 = pnand %p1046_p4, %p1040_p10 }
  0x2a   : > { %1050 = shalt.err (!%p1047_p5)
}
  0x2b   : > { %s1051_s11 = scalar_lea.vmem %s1334_s28, 192  ;;  %s1191_s15 = smov [#allocation4]  }
  0x2c   : > { %p1052_p6 = scmp.ne.s32.totalorder %s1334_s28, %s1051_s11  ;;  %s1056_s23 = sshll.u32 %s1191_s15, 4  ;;  %s1057_s23 = int_to_ptr.vmem [resolvable:$false] %s1056_s23 }
  0x2d   : > { %s1058_s30 = scalar_lea.vmem %s1057_s23, 384  ;;  %p1059_p13 = scmp.lt.s32.totalorder %s1334_s28, %s1057_s23 }
  0x2e   : > { %p1054_p9 = pnand %p1052_p6, %p1038_p7  ;;  %p1060_p11 = scmp.lt.s32.totalorder %s1058_s30, %s1051_s11 }
  0x30   : > { %p1055_p2 = pneg %p1054_p9  ;;  %p1061_p12 = por %p1060_p11, %p1059_p13 }
  0x32   : > { %p1062_p0 = pnand %p1061_p12, %p1055_p2 }
  0x34   : > { %1065 = shalt.err (!%p1062_p0)
}
  0x35   : > { %854 = dma.hbm_to_vmem [thread:$0]  (!%p1330_p3), %s1341_s6, 192, %s1334_s28, %s158_s29  }
  0x36   : > { %p1515_p4 = scmp.lt.s32.totalorder %s1189_s22, 5  ;;  %p1516_p5 = scmp.ge.s32.totalorder %s1189_s22, 1 }
  0x38   : > { %p179_p7 = pnand %p1516_p5, %p1515_p4 }
  0x39   : > { %s184_s26 = sand.u32 (!%p179_p7), 1, %s1165_s16  }
  0x3a   : > { %182 = sbr.rel (%p179_p7) target bundleno = 603 (0x25b), region = 32  ;;  %s185_s5 = scalar_lea.sflag (!%p179_p7), [#allocation5], %s184_s26 }
  0x3b   : > { %s844_s24 = smul.u32 (!%p179_p7), 12, %s184_s26 }
  0x3d   : > { %s188_s11 = scalar_lea.vmem (!%p179_p7), [#allocation4], %s844_s24 }
  0x41   : > { %1139 = dma.done.wait (%p1303_p8), %s185_s5, 192  }
  0x42   : > { %1141 = vsyncadd (%p1303_p8), %s185_s5, 4294967104  ;;  %s208_s27 = sand.u32 1, %s1153_s13   ;;  %p774_p13 = scmp.ne.s32.totalorder %s1173_s18, 0 }
  0x43   : > { %s845_s28 = smul.u32 24, %s208_s27  ;;  %vm222_vm0 = vcmask (!%p774_p13), 408576   ;;  %v1192_v0 = vmov (!%p774_p13), 0.0  }
  0x44   : > { %218 = sbr.rel (%p774_p13) target bundleno = 75 (0x4b), region = 40  ;;  %219 = vst [vmem:[#allocation2] sm:$0xff] (!%p774_p13), %v1192_v0  ;;  %220 = vst [vmem:[#allocation2 + $0x8] sm:$0xff] (!%p774_p13), %v1192_v0 }
  0x45   : > { %s1381_s6 = scalar_lea.vmem [#allocation7], %s845_s28  ;;  %221 = vst [vmem:[#allocation2 + $0x10] sm:$0xff] (!%p774_p13), %v1192_v0  ;;  %223 = vst.msk [vmem:[#allocation2 + $0x18] sm:$0xff] (!%p774_p13), %vm222_vm0, %v1192_v0 }
  0x4b PF: > { %p775_p8 = scmp.ge.s32.totalorder %s1173_s18, 1 }
  0x4c   : > { %v228_v1 = vld [vmem:[%s188_s11] sm:$0xff] (!%p775_p8)  ;;  %v229_v2 = vld [vmem:[%s188_s11 + $0x8] sm:$0xf] (!%p775_p8)  ;;  %s1193_s4 = smov (!%p775_p8), 48   ;;  %vm246_vm1 = vcmask (!%p775_p8), 1043840   ;;  %vm250_vm2 = vcmask (!%p775_p8), 388096  }
  0x4d   : > { %227 = sbr.rel (%p775_p8) target bundleno = 198 (0xc6), region = 44  ;;  %233 = vrot.lane.b32.xlu0 (!%p775_p8), %v228_v1, %s1193_s4  ;;  %v232_v3 = vcombine.high (!%p775_p8), %v228_v1, %v228_v1  ;;  %237 = vrot.lane.b32.xlu1 (!%p775_p8), %v229_v2, %s1193_s4  ;;  %vm239_vm3 = vcmask (!%p775_p8), 392192  }
  0x51   : > { %235 = vrot.lane.b32.xlu0 (!%p775_p8), %v232_v3, %s1193_s4 }
  0xbf   : > { %v234_v4 = vpop.permute.xlu0 %233  ;;  %v238_v5 = vpop.permute.xlu1 %237 }
  0xc0   : > { %247 = vst.msk [vmem:[#allocation2] sm:$0xf] %vm246_vm1, %v234_v4 }
  0xc1   : > { %251 = vst.msk [vmem:[#allocation2 + $0x18] sm:$0xf] %vm250_vm2, %v238_v5 }
  0xc3   : > { %v236_v6 = vpop.permute.xlu0 %235 }
  0xc4   : > { %v240_v7 = vsel %vm239_vm3, %v234_v4, %v236_v6  ;;  %v241_v8 = vsel %vm239_vm3, %v236_v6, %v238_v5 }
  0xc5   : > { %248 = vst [vmem:[#allocation2 + $0x8] sm:$0xf] %v240_v7  ;;  %249 = vst [vmem:[#allocation2 + $0x10] sm:$0xf] %v241_v8 }
  0xc6 PF: > { %p776_p2 = scmp.lt.s32.totalorder %s1173_s18, 1 }
  0xc7   : > { %vm256_vm4 = vcmask (!%p776_p2), 1047936   ;;  %vm260_vm5 = vcmask (!%p776_p2), 392192   ;;  %v1194_v9 = vmov (!%p776_p2), 0.0  }
  0xc8   : > { %255 = sbr.rel (%p776_p2) target bundleno = 207 (0xcf), region = 48  ;;  %257 = vst.msk [vmem:[#allocation2] sm:$0xff] (!%p776_p2), %vm256_vm4, %v1194_v9  ;;  %258 = vst [vmem:[#allocation2 + $0x8] sm:$0xff] (!%p776_p2), %v1194_v9 }
  0xc9   : > { %259 = vst [vmem:[#allocation2 + $0x10] sm:$0xff] (!%p776_p2), %v1194_v9  ;;  %261 = vst.msk [vmem:[#allocation2 + $0x18] sm:$0xff] (!%p776_p2), %vm260_vm5, %v1194_v9 }
  0xcf PF: > { %v295_v10 = vld [vmem:[#allocation2 + $0x8] sm:$0xff]  ;;  %v1390_v12 = vld [vmem:[#allocation2] sm:$0xff]  ;;  %v1195_v15 = vmov 0.0|0.0   ;;  %s1196_s29 = smov 126   ;;  %s1197_s15 = smov 127   ;;  %v1201_v17 = vmov 0.0  }
  0xd0   : > { %v1388_v11 = vld [vmem:[#allocation2 + $0x10] sm:$0xff]  ;;  %v271_v14 = vld [vmem:[#allocation2 + $0x18] sm:$0xff]  ;;  %830 = vmatprep.subr.bf16.mxu1 %v1195_v15  ;;  %s1198_s23 = smov 104   ;;  %s1199_s30 = smov 102   ;;  %578 = vmatprep.mubr.f32.mxu0 %v1201_v17  ;;  %vm1204_vm6 = vmmov 0   ;;  %v1205_v18 = vmov 0  }
  0xd1   : > { %v975_v13 = vpack.i.bf16 %v1388_v11, %v295_v10  ;;  %v970_v16 = vpack.i.bf16 %v271_v14, %v1390_v12  ;;  %s1200_s26 = smov 103   ;;  %s1202_s24 = smov 79   ;;  %811 = vmatprep.mubr.msk.f32.mxu1 %vm1204_vm6, %v1201_v17  ;;  %1035 = vset.pattern.permute.xlu0 %v1205_v18  ;;  %v504_v19 = vld [vmem:[%s1505_s2] sm:$0xff]  ;;  %vm284_vm7 = vcmask 1039360   ;;  %vm310_vm8 = vcmask 1031168  }
  0xd2   : > { %s1203_s5 = smov 80   ;;  %s1206_s11 = smov 78   ;;  %vm336_vm9 = vcmask 850944   ;;  %vm362_vm10 = vcmask 842752   ;;  %vm388_vm11 = vcmask 834560   ;;  %vm414_vm12 = vcmask 654336  }
  0xd3   : > { %976 = vrot.lane.b32.xlu1 %v975_v13, %s1196_s29  ;;  %966 = vrot.lane.b32.xlu0 %v975_v13, %s1197_s15  ;;  %vm440_vm13 = vcmask 646144   ;;  %vm466_vm14 = vcmask 637952   ;;  %vm510_vm15 = vcmask 588800   ;;  %vm662_vm0 = vcmask (!%p775_p8), 392192  }
  0xd7   : > { %981 = vrot.lane.b32.xlu1 %v975_v13, %s1198_s23  ;;  %971 = vrot.lane.b32.xlu0 %v970_v16, %s1197_s15 }
  0xdb   : > { %991 = vrot.lane.b32.xlu1 %v970_v16, %s1198_s23  ;;  %986 = vrot.lane.b32.xlu0 %v970_v16, %s1196_s29 }
  0xdf   : > { %1001 = vrot.lane.b32.xlu1 %v975_v13, %s1199_s30  ;;  %996 = vrot.lane.b32.xlu0 %v975_v13, %s1200_s26 }
  0xe3   : > { %1011 = vrot.lane.b32.xlu1 %v970_v16, %s1199_s30  ;;  %1006 = vrot.lane.b32.xlu0 %v970_v16, %s1200_s26 }
  0xe7   : > { %1021 = vrot.lane.b32.xlu1 %v975_v13, %s1202_s24  ;;  %1016 = vrot.lane.b32.xlu0 %v975_v13, %s1203_s5 }
  0xeb   : > { %1031 = vrot.lane.b32.xlu1 %v970_v16, %s1202_s24  ;;  %1026 = vrot.lane.b32.xlu0 %v970_v16, %s1203_s5 }
  0xef   : > { %462 = vrot.lane.b32.xlu1 %v1388_v11, %s1206_s11  ;;  %460 = vrot.lane.b32.xlu0 %v295_v10, %s1206_s11 }
  0xf3   : > { %464 = vrot.lane.b32.xlu1 %v271_v14, %s1206_s11  ;;  %458 = vrot.lane.b32.xlu0 %v1390_v12, %s1206_s11 }
  0xf7   : > { %507 = vperm.xlu0 %1035, %v504_v19  }
 0x145   : > { %v977_v20 = vpop.permute.xlu1 %976  ;;  %v967_v21 = vpop.permute.xlu0 %966 }
 0x146   : > { %v969_v22 = vunpack.i.h.bf16 %v967_v21  ;;  %v968_v23 = vunpack.i.l.bf16 %v967_v21  ;;  %v979_v24 = vunpack.i.h.bf16 %v977_v20  ;;  %v978_v25 = vunpack.i.l.bf16 %v977_v20 }
 0x148   : > { %v286_v26 = vsel %vm284_vm7, %v968_v23, %v969_v22  ;;  %v312_v36 = vsel %vm310_vm8, %v978_v25, %v979_v24 }
 0x149   : > { %v982_v27 = vpop.permute.xlu1 %981  ;;  %v972_v28 = vpop.permute.xlu0 %971  ;;  %v814_v29 = vpack.c.bf16 %v286_v26, %v295_v10 }
 0x14a   : > { %v984_v30 = vunpack.i.h.bf16 %v982_v27  ;;  %v983_v31 = vunpack.i.l.bf16 %v982_v27  ;;  %v974_v32 = vunpack.i.h.bf16 %v972_v28  ;;  %v973_v33 = vunpack.i.l.bf16 %v972_v28 }
 0x14b   : > { %815 = vmatprep.subr.bf16.mxu0 %v814_v29 }
 0x14c   : > { %v285_v34 = vsel %vm284_vm7, %v973_v33, %v968_v23  ;;  %v287_v35 = vsel %vm284_vm7, %v969_v22, %v974_v32  ;;  %v338_v37 = vsel %vm336_vm9, %v983_v31, %v984_v30 }
 0x14d   : > { %v992_v38 = vpop.permute.xlu1 %991  ;;  %v987_v39 = vpop.permute.xlu0 %986  ;;  %v816_v40 = vpack.c.bf16 %v285_v34, %v1390_v12  ;;  %v831_v41 = vpack.c.bf16 %v287_v35, %v1388_v11  ;;  %v818_v42 = vpack.c.bf16 %v338_v37, %v312_v36  ;;  %v476_v37 = vld [vmem:[%s1504_s1] sm:$0xff] }
 0x14e   : > { %v994_v43 = vunpack.i.h.bf16 %v992_v38  ;;  %v993_v44 = vunpack.i.l.bf16 %v992_v38  ;;  %v989_v45 = vunpack.i.h.bf16 %v987_v39  ;;  %v988_v46 = vunpack.i.l.bf16 %v987_v39 }
 0x14f   : > { %817 = vmatpush1.bf16.msra.mxu0 %v816_v40  ;;  %832 = vmatpush3.bf16.msra.mxu1 %v831_v41 }
 0x150   : > { %819 = vmatprep.subr.bf16.mxu0 %v818_v42  ;;  %833 = vmatprep.subr.bf16.mxu1 %v1195_v15  ;;  %v311_v47 = vsel %vm310_vm8, %v988_v46, %v978_v25  ;;  %v337_v48 = vsel %vm336_vm9, %v993_v44, %v983_v31  ;;  %v313_v49 = vsel %vm310_vm8, %v979_v24, %v989_v45 }
 0x151   : > { %v1002_v50 = vpop.permute.xlu1 %1001  ;;  %v997_v51 = vpop.permute.xlu0 %996  ;;  %v820_v52 = vpack.c.bf16 %v337_v48, %v311_v47  ;;  %v339_v53 = vsel %vm336_vm9, %v984_v30, %v994_v43  ;;  %v661_v47 = vld [vmem:[#allocation2 + $0x18] sm:$0xff] (!%p775_p8) }
 0x152   : > { %v1004_v54 = vunpack.i.h.bf16 %v1002_v50  ;;  %v1003_v55 = vunpack.i.l.bf16 %v1002_v50  ;;  %v999_v56 = vunpack.i.h.bf16 %v997_v51  ;;  %v998_v57 = vunpack.i.l.bf16 %v997_v51  ;;  %663 = vst.msk [vmem:[#allocation2] sm:$0xff] (!%p775_p8), %vm662_vm0, %v661_v47 }
 0x153   : > { %821 = vmatpush1.bf16.msra.mxu0 %v820_v52  ;;  %v834_v58 = vpack.c.bf16 %v339_v53, %v313_v49 }
 0x154   : > { %v364_v59 = vsel %vm362_vm10, %v998_v57, %v999_v56  ;;  %v390_v60 = vsel %vm388_vm11, %v1003_v55, %v1004_v54 }
 0x155   : > { %835 = vmatpush3.bf16.msra.mxu1 %v834_v58  ;;  %v1012_v61 = vpop.permute.xlu1 %1011  ;;  %v1007_v62 = vpop.permute.xlu0 %1006  ;;  %v822_v63 = vpack.c.bf16 %v390_v60, %v364_v59 }
 0x156   : > { %v1014_v0 = vunpack.i.h.bf16 %v1012_v61  ;;  %v1013_v1 = vunpack.i.l.bf16 %v1012_v61  ;;  %v1009_v2 = vunpack.i.h.bf16 %v1007_v62  ;;  %v1008_v3 = vunpack.i.l.bf16 %v1007_v62  ;;  %836 = vmatprep.subr.bf16.mxu1 %v1195_v15 }
 0x157   : > { %823 = vmatprep.subr.bf16.mxu0 %v822_v63 }
 0x158   : > { %v363_v4 = vsel %vm362_vm10, %v1008_v3, %v998_v57  ;;  %v389_v5 = vsel %vm388_vm11, %v1013_v1, %v1003_v55  ;;  %v365_v6 = vsel %vm362_vm10, %v999_v56, %v1009_v2  ;;  %v391_v7 = vsel %vm388_vm11, %v1004_v54, %v1014_v0 }
 0x159   : > { %v1022_v8 = vpop.permute.xlu1 %1021  ;;  %v1017_v9 = vpop.permute.xlu0 %1016  ;;  %v824_v10 = vpack.c.bf16 %v389_v5, %v363_v4  ;;  %v837_v11 = vpack.c.bf16 %v391_v7, %v365_v6 }
 0x15a   : > { %v1024_v12 = vunpack.i.h.bf16 %v1022_v8  ;;  %v1023_v13 = vunpack.i.l.bf16 %v1022_v8  ;;  %v1019_v14 = vunpack.i.h.bf16 %v1017_v9  ;;  %v1018_v16 = vunpack.i.l.bf16 %v1017_v9 }
 0x15b   : > { %825 = vmatpush1.bf16.msra.mxu0 %v824_v10  ;;  %838 = vmatpush3.bf16.msra.mxu1 %v837_v11 }
 0x15c   : > { %v416_v18 = vsel %vm414_vm12, %v1018_v16, %v1019_v14  ;;  %v442_v19 = vsel %vm440_vm13, %v1023_v13, %v1024_v12  ;;  %839 = vmatprep.subr.bf16.mxu1 %v1195_v15 }
 0x15d   : > { %v1032_v20 = vpop.permute.xlu1 %1031  ;;  %v1027_v21 = vpop.permute.xlu0 %1026  ;;  %v826_v22 = vpack.c.bf16 %v442_v19, %v416_v18 }
 0x15e   : > { %v1034_v23 = vunpack.i.h.bf16 %v1032_v20  ;;  %v1033_v24 = vunpack.i.l.bf16 %v1032_v20  ;;  %v1029_v25 = vunpack.i.h.bf16 %v1027_v21  ;;  %v1028_v26 = vunpack.i.l.bf16 %v1027_v21 }
 0x15f   : > { %827 = vmatprep.subr.bf16.mxu0 %v826_v22 }
 0x160   : > { %v415_v27 = vsel %vm414_vm12, %v1028_v26, %v1018_v16  ;;  %v441_v28 = vsel %vm440_vm13, %v1033_v24, %v1023_v13  ;;  %v417_v29 = vsel %vm414_vm12, %v1019_v14, %v1029_v25  ;;  %v443_v30 = vsel %vm440_vm13, %v1024_v12, %v1034_v23 }
 0x161   : > { %v463_v31 = vpop.permute.xlu1 %462  ;;  %v461_v32 = vpop.permute.xlu0 %460  ;;  %v828_v15 = vpack.c.bf16 %v441_v28, %v415_v27  ;;  %v840_v33 = vpack.c.bf16 %v443_v30, %v417_v29 }
 0x162   : > { %v468_v34 = vsel %vm466_vm14, %v461_v32, %v463_v31 }
 0x163   : > { %829 = vmatpush1.bf16.msra.mxu0 %v828_v15  ;;  %841 = vmatpush3.bf16.msra.mxu1 %v840_v33 }
 0x164   : > { %530 = vmatprep.subr.mxu0 %v468_v34  ;;  %809 = vmatprep.subr.mxu1 %v1201_v17 }
 0x165   : > { %v465_v35 = vpop.permute.xlu1 %464  ;;  %v459_v36 = vpop.permute.xlu0 %458 }
 0x166   : > { %v467_v38 = vsel %vm466_vm14, %v459_v36, %v461_v32  ;;  %v469_v39 = vsel %vm466_vm14, %v463_v31, %v465_v35 }
 0x167   : > { %531 = vmatpush1.msra.mxu0 %v467_v38  ;;  %810 = vmatpush3.msra.mxu1 %v469_v39 }
 0x168   : > { %777 = vmatmul.mubr.msk.f32.vlgmr.msra.gmra.mrb[0].mxu0 %vm510_vm15, %v476_v37  ;;  %812 = vmatmul.mubr.msk.f32.vlgmr.msra.gmra.mrb[0].mxu1 %vm510_vm15, %v476_v37 }
 0x176   : > { %v508_v40 = vpop.permute.xlu0 %507 }
 0x239   : > { %660 = sbr.rel (%p775_p8) target bundleno = 576 (0x240), region = 52 }
 0x23b   : > { %v580_v17 = vpop.f32.mrb[0].mxu0  ;;  %v651_v41 = vpop.f32.mrb[0].mxu1 }
 0x23c   : > { %v581_v42 = vadd.f32 %v580_v17, %v508_v40  ;;  %v652_v43 = vadd.f32 %v651_v41, %v508_v40  ;;  %v582_v44 = vpop.f32.mrb[1].mxu0  ;;  %v813_v45 = vpop.f32.mrb[1].mxu1 }
 0x23d   : > { %v583_v46 = vadd.f32 %v582_v44, %v508_v40 }
 0x23e   : > { %655 = vst [vmem:[%s1381_s6] sm:$0xff] %v581_v42  ;;  %657 = vst [vmem:[%s1381_s6 + $0x10] sm:$0xff] %v652_v43 }
 0x23f   : > { %656 = vst [vmem:[%s1381_s6 + $0x8] sm:$0xff] %v583_v46 }
 0x240 PF: > { %s672_s23 = smul.u32 3, %s1173_s18  ;;  %s681_s26 = sshll.u32 %s1381_s6, 4  ;;  %s1443_s26 = int_to_ptr.vmem [resolvable:$true] %s681_s26 }
 0x241   : > { %s846_s30 = smul.u32 6, %s1177_s19  ;;  %s665_s29 = scalar_lea.sflag [#allocation6], %s208_s27 }
 0x242   : > { %s1066_s15 = scalar_lea.vmem %s1443_s26, 384  ;;  %p1517_p10 = scmp.ne.s32.totalorder %s1512_s9, 0 }
 0x243   : > { %s677_s24 = sadd.s32 %s846_s30, %s672_s23  ;;  %p1067_p3 = scmp.ne.s32.totalorder %s1443_s26, %s1066_s15 }
 0x244   : > { %s780_s5 = sshll.u32 %s677_s24, 7  ;;  %s1207_s18 = smov [#allocation7]  }
 0x245   : > { %s679_s4 = scalar_lea.hbm %s1506_s3, %s780_s5  ;;  %p1068_p1 = pnand %p1067_p3, %p1517_p10 }
 0x246   : > { %s1070_s19 = sshll.u32 %s1207_s18, 4  ;;  %s1071_s19 = int_to_ptr.vmem [resolvable:$false] %s1070_s19 }
 0x247   : > { %p1069_p6 = pneg %p1068_p1  ;;  %s1072_s6 = scalar_lea.vmem %s1071_s19, 768 }
 0x248   : > { %p1073_p9 = scmp.lt.s32.totalorder %s1443_s26, %s1071_s19  ;;  %p1074_p11 = scmp.lt.s32.totalorder %s1072_s6, %s1066_s15 }
 0x24a   : > { %p1075_p12 = por %p1074_p11, %p1073_p9 }
 0x24c   : > { %p1076_p0 = pnand %p1075_p12, %p1069_p6 }
 0x24e   : > { %1079 = shalt.err (!%p1076_p0)
}
 0x24f   : > { %s1080_s23 = scalar_lea.hbm %s679_s4, 384  ;;  %s1084_s24 = scalar_lea.hbm %s1506_s3, 1536 }
 0x250   : > { %p1081_p4 = scmp.ne.s32.totalorder %s679_s4, %s1080_s23  ;;  %p1085_p13 = scmp.lt.u32.totalorder %s679_s4, %s1506_s3 }
 0x251   : > { %p1086_p8 = scmp.lt.u32.totalorder %s1084_s24, %s1080_s23  ;;  %p1088_p3 = scmp.lt.u32.totalorder %s1080_s23, %s679_s4 }
 0x252   : > { %p1082_p5 = pnand %p1081_p4, %p1517_p10 }
 0x253   : > { %p1087_p2 = por %p1086_p8, %p1085_p13 }
 0x254   : > { %p1083_p7 = pneg %p1082_p5 }
 0x255   : > { %p1089_p1 = por %p1088_p3, %p1087_p2 }
 0x257   : > { %p1090_p6 = pnand %p1089_p1, %p1083_p7 }
 0x259   : > { %1093 = shalt.err (!%p1090_p6)
}
 0x25a   : > { %849 = dma.vmem_to_hbm [thread:$0]  (%p1517_p10), %s1443_s26, 384, %s679_s4, %s665_s29  }
 0x25b PF: > { %p860_p9 = scmp.ge.s32.totalorder %s1189_s22, 2  ;;  %s693_s28 = sand.u32 1, %s1149_s12  }
 0x25c   : > { %p1518_p11 = scmp.ne.s32.totalorder %s1513_s10, 0  ;;  %s694_s15 = scalar_lea.sflag [#allocation6], %s693_s28 }
 0x25e   : > { %p856_p12 = pnand %p860_p9, %p1518_p11 }
 0x260   : > { %1143 = dma.done.wait (!%p856_p12), %s694_s15, 384  }
 0x261   : > { %1145 = vsyncadd (!%p856_p12), %s694_s15, 4294966912  ;;  %s19_s22 = sadd.s32 1, %s1189_s22   ;;  %s1519_s9 = sld [smem:[#allocation10_spill]] }
 0x262   : > { %p16_p0 = scmp.ge.s32.totalorder %s19_s22, 6   ;;  %s1520_s12 = smov %s1153_s13 }
 0x263   : > { %s1521_s13 = smov %s1157_s14  ;;  %s1522_s14 = smov %s1316_s8 }
 0x264   : > { %s1523_s15 = smov %s1165_s16  ;;  %s1524_s16 = smov %s1169_s17 }
 0x265   : > { %s1525_s17 = smov %s1309_s7  ;;  %s1526_s18 = smov %s1181_s20 }
 0x266   : > { %s1527_s19 = smov %s1185_s21  ;;  %s1528_s20 = smov %s1531_s25 }
 0x267   : > { %s1529_s21 = smov %s1519_s9  ;;  %18 = sbr.rel (!%p16_p0) target bundleno = 9 (0x9), region = 93 }
 0x26e   :  { %699 = vsyncpa [#allocation5], 1 }
 0x26f   :  { %701 = vsyncpa [#allocation5 + $0x1], 1 }
 0x270   :  { %702 = vsyncpa [#allocation6], 1 }
 0x271   :  { %704 = vsyncpa [#allocation6 + $0x1], 1 }

</bundles_post_ra>
